<compile_context>
chip_gen: v6e
topology: v6e:2x2x1
jax: 0.10.0
libtpu: 0.0.40
codegen_flags: <defaults>
</compile_context>

<pallas_src>
import numpy as np
import jax
import jax.numpy as jnp
from jax.experimental import pallas as pl
from jax.experimental.pallas import tpu as pltpu


def _pick_lane_tile(L: int, max_lanes: int = 2048) -> int:
    """Largest lane-dense tile (multiple of 128) that evenly divides L.

    Falls back to the full trailing dim when L is small or not a multiple of
    128 (the full dim is always a legal block shape).
    """
    if L <= max_lanes or L % 128 != 0:
        return L
    for t in (2048, 1024, 512, 256, 128):
        if L % t == 0:
            return t
    return L


def _make_concat_kernel(channel_offsets):
    offs = tuple(int(o) for o in channel_offsets)

    def kernel(*refs):
        # refs = (*input_refs, out_ref); each input is (1, C_i, tile_L),
        # out is (1, C_out, tile_L).  Pure lane-dense copies into channel
        # slices of the output block.
        o_ref = refs[-1]
        for i, r in enumerate(refs[:-1]):
            o_ref[:, offs[i]:offs[i + 1], :] = r[...]

    return kernel


def _channel_concat_lanedense(slabs):
    """Concat [B, C_i, L] arrays along the channel dim with a Pallas kernel."""
    B, _, L = slabs[0].shape
    c_sizes = [int(s.shape[1]) for s in slabs]
    c_offs = np.cumsum([0] + c_sizes)
    C_out = int(c_offs[-1])
    dtype = slabs[0].dtype

    tile_L = _pick_lane_tile(L)
    n_l = L // tile_L

    in_specs = [
        pl.BlockSpec((1, c, tile_L), lambda b, l: (b, 0, l)) for c in c_sizes
    ]
    out_spec = pl.BlockSpec((1, C_out, tile_L), lambda b, l: (b, 0, l))

    return pl.pallas_call(
        _make_concat_kernel(c_offs),
        out_shape=jax.ShapeDtypeStruct((B, C_out, L), dtype),
        grid_spec=pltpu.PrefetchScalarGridSpec(
            num_scalar_prefetch=0,
            grid=(B, n_l),
            in_specs=in_specs,
            out_specs=out_spec,
        ),
        compiler_params=pltpu.CompilerParams(
            dimension_semantics=("parallel", "parallel"),
            vmem_limit_bytes=32 * 1024 * 1024,
        ),
    )(*slabs)


def attribute_augment(x, static=None, dynamic=None):
    """x: [B,F,N,T]; static: [B,P,N] or None; dynamic: [B,W,N,T] or None."""
    B, Fc, N, T = x.shape
    L = N * T

    slabs = [x.reshape(B, Fc, L)]
    if static is not None:
        _, P, _ = static.shape
        # Tiny (P*N per batch): pre-broadcast wrapper-side so the kernel stays
        # a pure lane-dense copy (no in-kernel lane-repeat / XLU relayout).
        s = jnp.broadcast_to(static[..., None], (B, P, N, T)).reshape(B, P, L)
        slabs.append(s.astype(x.dtype))
    if dynamic is not None:
        W = dynamic.shape[1]
        slabs.append(dynamic.reshape(B, W, L).astype(x.dtype))

    if len(slabs) == 1:
        return x

    out = _channel_concat_lanedense(slabs)
    return out.reshape(B, out.shape[1], N, T)


def _reference(x, static=None, dynamic=None):
    feats = [x]
    if static is not None:
        B, P, N = static.shape
        T = x.shape[-1]
        feats.append(jnp.broadcast_to(static[..., None], (B, P, N, T)).astype(x.dtype))
    if dynamic is not None:
        feats.append(dynamic.astype(x.dtype))
    return jnp.concatenate(feats, axis=1)


if __name__ == "__main__":
    key = jax.random.PRNGKey(0)
    k1, k2, k3 = jax.random.split(key, 3)

    B, F, P, W, N, T = 2, 4, 3, 2, 16, 8
    x = jax.random.normal(k1, (B, F, N, T), dtype=jnp.float32)
    static = jax.random.normal(k2, (B, P, N), dtype=jnp.float32)
    dynamic = jax.random.normal(k3, (B, W, N, T), dtype=jnp.float32)

    out = attribute_augment(x, static, dynamic)
    out = jax.block_until_ready(out)

    ref = _reference(x, static, dynamic)
    assert out.shape == (B, F + P + W, N, T), out.shape
    assert jnp.allclose(out, ref, atol=0.0, rtol=0.0), "mismatch vs reference"

    # Also exercise the optional-argument paths of the PyTorch module.
    out_s = jax.block_until_ready(attribute_augment(x, static, None))
    assert jnp.allclose(out_s, _reference(x, static, None))
    out_x = jax.block_until_ready(attribute_augment(x, None, None))
    assert jnp.allclose(out_x, x)

    print("KERNEL_OK")
</pallas_src>

<mosaic_0001>
module attributes {stable_mosaic.version = 11 : i64} {
  func.func @kernel(%arg0: i32, %arg1: i32, %arg2: memref<1x4x128xf32, #tpu.memory_space<vmem>>, %arg3: memref<1x3x128xf32, #tpu.memory_space<vmem>>, %arg4: memref<1x2x128xf32, #tpu.memory_space<vmem>>, %arg5: memref<1x9x128xf32, #tpu.memory_space<vmem>>) attributes {dimension_semantics = [#tpu.dimension_semantics<parallel>, #tpu.dimension_semantics<parallel>], iteration_bounds = array<i64: 2, 1>, scalar_prefetch = 0 : i64, scratch_operands = 0 : i64, tpu.core_type = #tpu.core_type<tc>, window_params = [{transform_indices = @transform_0, window_bounds = array<i64: 1, 4, 128>}, {transform_indices = @transform_1, window_bounds = array<i64: 1, 3, 128>}, {transform_indices = @transform_2, window_bounds = array<i64: 1, 2, 128>}, {transform_indices = @transform_3, window_bounds = array<i64: 1, 9, 128>}]} {
    %c0 = arith.constant 0 : index
    %c0_0 = arith.constant 0 : index
    %c0_1 = arith.constant 0 : index
    %0 = vector.load %arg2[%c0, %c0_0, %c0_1] : memref<1x4x128xf32, #tpu.memory_space<vmem>>, vector<1x4x128xf32>
    %c0_2 = arith.constant 0 : index
    %c0_3 = arith.constant 0 : index
    %c0_4 = arith.constant 0 : index
    %1 = vector.load %arg5[%c0_2, %c0_3, %c0_4] : memref<1x9x128xf32, #tpu.memory_space<vmem>>, vector<1x4x128xf32>
    tpu.vector_store %arg5[%c0_2, %c0_3, %c0_4], %0 {strides = array<i32>} : memref<1x9x128xf32, #tpu.memory_space<vmem>>, vector<1x4x128xf32>,
    %c0_5 = arith.constant 0 : index
    %c0_6 = arith.constant 0 : index
    %c0_7 = arith.constant 0 : index
    %2 = vector.load %arg3[%c0_5, %c0_6, %c0_7] : memref<1x3x128xf32, #tpu.memory_space<vmem>>, vector<1x3x128xf32>
    %c0_8 = arith.constant 0 : index
    %c4 = arith.constant 4 : index
    %c0_9 = arith.constant 0 : index
    %3 = vector.load %arg5[%c0_8, %c4, %c0_9] : memref<1x9x128xf32, #tpu.memory_space<vmem>>, vector<1x3x128xf32>
    tpu.vector_store %arg5[%c0_8, %c4, %c0_9], %2 {strides = array<i32>} : memref<1x9x128xf32, #tpu.memory_space<vmem>>, vector<1x3x128xf32>,
    %c0_10 = arith.constant 0 : index
    %c0_11 = arith.constant 0 : index
    %c0_12 = arith.constant 0 : index
    %4 = vector.load %arg4[%c0_10, %c0_11, %c0_12] : memref<1x2x128xf32, #tpu.memory_space<vmem>>, vector<1x2x128xf32>
    %c0_13 = arith.constant 0 : index
    %c7 = arith.constant 7 : index
    %c0_14 = arith.constant 0 : index
    %5 = vector.load %arg5[%c0_13, %c7, %c0_14] : memref<1x9x128xf32, #tpu.memory_space<vmem>>, vector<1x2x128xf32>
    tpu.vector_store %arg5[%c0_13, %c7, %c0_14], %4 {strides = array<i32>} : memref<1x9x128xf32, #tpu.memory_space<vmem>>, vector<1x2x128xf32>,
    return
  }
  func.func @transform_0(%arg0: i32, %arg1: i32) -> (i32, i32, i32) {
    %c0_i32 = arith.constant 0 : i32
    %c0_i32_0 = arith.constant 0 : i32
    return %arg0, %c0_i32, %arg1 : i32, i32, i32
  }
  func.func @transform_1(%arg0: i32, %arg1: i32) -> (i32, i32, i32) {
    %c0_i32 = arith.constant 0 : i32
    %c0_i32_0 = arith.constant 0 : i32
    return %arg0, %c0_i32, %arg1 : i32, i32, i32
  }
  func.func @transform_2(%arg0: i32, %arg1: i32) -> (i32, i32, i32) {
    %c0_i32 = arith.constant 0 : i32
    %c0_i32_0 = arith.constant 0 : i32
    return %arg0, %c0_i32, %arg1 : i32, i32, i32
  }
  func.func @transform_3(%arg0: i32, %arg1: i32) -> (i32, i32, i32) {
    %c0_i32 = arith.constant 0 : i32
    %c0_i32_0 = arith.constant 0 : i32
    return %arg0, %c0_i32, %arg1 : i32, i32, i32
  }
}

</mosaic_0001>

<bundles_post_ra>
// kernel: tpu_custom_call.1
= control target key start
LH: loop header
LB: loop body
LE: loop exit
PB: predicated region body
PF: predicated region fallthrough
CT: control target
= control target key end

     0   :  { %s452_s12 = smov 0   ;;  %s454_s13 = smov 0   ;;  %s479_s0 = inlined_call_operand.vmem [shape: f32[2,4,128], index: 0, kind: input, shape index: {}]   ;;  %s480_s1 = inlined_call_operand.vmem [shape: f32[2,3,128], index: 1, kind: input, shape index: {}]   ;;  %s481_s2 = inlined_call_operand.vmem [shape: f32[2,2,128], index: 2, kind: input, shape index: {}]   ;;  %s482_s3 = inlined_call_operand.vmem [shape: f32[2,9,128], index: 3, kind: output, shape index: {}]  }
   0x1   :  { %s456_s14 = smov 0  }
   0x2 LB: > { %s25_s15 = sadd.s32 1, %s426_s13  ;;  %p375_p0 = scmp.ge.s32.totalorder %s430_s14, 1  ;;  %s430_s14 = sphi %s456_s14, %s13_s14   ;;  %s426_s13 = sphi %s454_s13, %s484_s13   ;;  %s422_s12 = sphi %s452_s12, %s483_s12  }
   0x3   : > { %p27_p1 = scmp.ge.s32.totalorder %s25_s15, 2  ;;  %p183_p2 = scmp.lt.s32.totalorder %s430_s14, 3 }
   0x5   : > { %s486_s15 = smov (%p27_p1, %s25_s15), 0  ;;  %p184_p3 = pnand %p375_p0, %p183_p2 }
   0x6   : > { %p226_p4 = scmp.lt.s32.totalorder (!%p184_p3), %s422_s12, 1 }
   0x7   : > { %187 = sbr.rel (%p184_p3) target bundleno = 19 (0x13), region = 32 }
   0xc   : > { %s488_s12 = smov (!%p226_p4, %s422_s12), 1 }
   0xd   : > { %s376_s16 = sshll.u32 %s488_s12, 2  ;;  %s383_s17 = sshll.u32 %s488_s12, 4 }
   0xe   : > { %s232_s20 = scalar_lea.vmem %s479_s0, %s376_s16  ;;  %s254_s23 = scalar_lea.vmem %s482_s3, %s383_s17 }
   0xf   : > { %v255_v0 = vld [vmem:[%s232_s20] sm:$0xf]  ;;  %s239_s26 = scalar_lea.vmem %s480_s1, %s376_s16  ;;  %s378_s27 = sshll.u32 %s488_s12, 1 }
  0x10   : > { %256 = vst [vmem:[%s254_s23] sm:$0xf] %v255_v0  ;;  %v257_v1 = vld [vmem:[%s239_s26] sm:$0x7]  ;;  %s246_s30 = scalar_lea.vmem %s481_s2, %s378_s27 }
  0x11   : > { %258 = vst [vmem:[%s254_s23 + $0x4] sm:$0x7] %v257_v1  ;;  %v259_v2 = vld [vmem:[%s246_s30] sm:$0x3] }
  0x12   : > { %260 = vst [vmem:[%s254_s23 + $0x7] sm:$0x3] %v259_v2 }
  0x13 PF: > { %s13_s14 = sadd.s32 1, %s430_s14   ;;  %s483_s12 = smov %s426_s13 }
  0x14   : > { %p10_p5 = scmp.ge.s32.totalorder %s13_s14, 4   ;;  %s484_s13 = smov %s486_s15 }
  0x16   :  { %12 = sbr.rel (!%p10_p5) target bundleno = 2 (0x2), region = 68 }

</bundles_post_ra>
